<compile_context>
chip_gen: v6e
topology: v6e:2x2x1
jax: 0.10.0
libtpu: 0.0.40
codegen_flags: <defaults>
</compile_context>

<pallas_src>
import jax
import jax.numpy as jnp
from jax.experimental import pallas as pl
from jax.experimental.pallas import tpu as pltpu


TYPE_VOCAB = 19        # number of Pokemon types
TYPE_ROWS = 24         # type table zero-padded to an 8-sublane multiple
ABILITY_VOCAB = 64     # number of abilities (stand-in vocab)
EMB_DIM = 16           # per-table embedding dim; concat -> 32
STATS_SIZE = 48
TOTAL_IN = 2 * EMB_DIM + STATS_SIZE   # 80
HIDDEN = (256, 128, 64)

TILE_CAP = 2048        # max batch rows per grid step
SINGLE_TILE_MAX = 256  # below this, one full-array tile (no padding, no split)


def _round_up(n, m):
    return ((n + m - 1) // m) * m


# ----------------------------------------------------------------------------
# Fused Pallas kernel: (pre-fused) embedding gather + 4-layer MLP head
# ----------------------------------------------------------------------------
def _fused_forward_kernel(ids_ref, stats_ref,
                          t1w_ref, a1w_ref, w1s_ref, b1_ref,
                          w2_ref, b2_ref, w3_ref, b3_ref,
                          w4_ref, b4_ref, o_ref):
    tb = stats_ref.shape[0]

    ids = ids_ref[...]                       # (tb, 3) int32: [type1, type2, ability]
    t1 = ids[:, 0:1]
    t2 = ids[:, 1:2]
    ab = ids[:, 2:3]

    # ---- fused gather + layer-1: one-hot x (table @ W1-block) on the MXU ----
    # mean of the two type embeddings == 0.5 * (onehot(t1) + onehot(t2)) @ table
    iota_t = jax.lax.broadcasted_iota(jnp.int32, (tb, TYPE_ROWS), 1)
    oh_t = ((iota_t == t1).astype(jnp.bfloat16) +
            (iota_t == t2).astype(jnp.bfloat16)) * 0.5
    iota_a = jax.lax.broadcasted_iota(jnp.int32, (tb, ABILITY_VOCAB), 1)
    oh_a = (iota_a == ab).astype(jnp.bfloat16)

    h1 = (jnp.dot(oh_t, t1w_ref[...], preferred_element_type=jnp.float32) +
          jnp.dot(oh_a, a1w_ref[...], preferred_element_type=jnp.float32) +
          jnp.dot(stats_ref[...].astype(jnp.bfloat16), w1s_ref[...],
                  preferred_element_type=jnp.float32))
    h1 = jnp.maximum(h1 + b1_ref[...], 0.0)       # f32 bias/ReLU (Dropout = identity)

    h2 = jnp.dot(h1.astype(jnp.bfloat16), w2_ref[...],
                 preferred_element_type=jnp.float32)
    h2 = jnp.maximum(h2 + b2_ref[...], 0.0)

    h3 = jnp.dot(h2.astype(jnp.bfloat16), w3_ref[...],
                 preferred_element_type=jnp.float32)
    h3 = jnp.maximum(h3 + b3_ref[...], 0.0)

    # ---- final (64 -> 1) layer as f32 VPU multiply + lane reduce ----
    logits = jnp.sum(h3 * w4_ref[...], axis=-1)   # (tb,) f32
    logits = logits + b4_ref[0, 0]                # scalar final bias from SMEM
    # lane-dense store: batch lives in the lane dimension of the output block
    o_ref[...] = jax.nn.sigmoid(logits).reshape(1, tb)


# ----------------------------------------------------------------------------
# Wrapper: folds the embedding tables into W1, casts MXU operands to bf16,
# picks the batch tiling, and calls pallas_call.
# ----------------------------------------------------------------------------
def pokemon_counter_predictor(type1_ids, type2_ids, ability_ids, stats,
                              mlp_params, type_emb, ability_emb, *, tile_b=None):
    """(B,1)x3 int32 ids + (B,48) f32 stats -> (B,1) f32 counter probabilities."""
    B = stats.shape[0]
    (w1, b1), (w2, b2), (w3, b3), (w4, b4) = mlp_params

    # ---- batch tiling -------------------------------------------------------
    # Small B: a single full-array tile (no padding, no jnp.pad copy).
    # Larger B: >= 2 tiles so v7x's 2 TensorCores both get work; tile is a
    # multiple of 128 so the lane-dense (1, tile_b) output blocks are unmasked.
    # Pallas handles a partial last block (padded reads / masked writes).
    if tile_b is None:
        if B <= SINGLE_TILE_MAX:
            tile_b = B
        else:
            tile_b = min(TILE_CAP, _round_up((B + 1) // 2, 128))
    num_tiles = pl.cdiv(B, tile_b)

    # Pack the three id columns into one (B, 3) int32 stream (single small DMA).
    ids = jnp.concatenate([type1_ids, type2_ids, ability_ids], axis=1).astype(jnp.int32)

    # ---- parameter prep (tiny one-off XLA ops) ------------------------------
    # Fold the embedding tables into layer 1 and pad the type table to 24 rows.
    t1w = type_emb @ w1[:EMB_DIM]                                    # (19, 256)
    t1w = jnp.pad(t1w, ((0, TYPE_ROWS - TYPE_VOCAB), (0, 0)))        # (24, 256)
    t1w = t1w.astype(jnp.bfloat16)
    a1w = (ability_emb @ w1[EMB_DIM:2 * EMB_DIM]).astype(jnp.bfloat16)  # (64, 256)
    w1s = w1[2 * EMB_DIM:].astype(jnp.bfloat16)                      # (48, 256)
    w2b = w2.astype(jnp.bfloat16)
    w3b = w3.astype(jnp.bfloat16)
    w4row = w4.reshape(1, HIDDEN[-1]).astype(jnp.float32)            # (1, 64) f32
    b4s = b4.reshape(1, 1).astype(jnp.float32)                       # SMEM scalar

    def batch_spec(cols):
        return pl.BlockSpec((tile_b, cols), lambda i: (i, 0))

    def resident_spec(shape):
        return pl.BlockSpec(shape, lambda i: (0, 0))

    flops = 2 * B * (TYPE_ROWS * 256 + ABILITY_VOCAB * 256 + STATS_SIZE * 256
                     + 256 * 128 + 128 * 64 + 64)
    bytes_accessed = (B * 3 * 4                                       # packed ids
                      + B * STATS_SIZE * 4                            # stats
                      + (TYPE_ROWS + ABILITY_VOCAB + STATS_SIZE) * 256 * 2  # fused W1
                      + (256 * 128 + 128 * 64) * 2                    # bf16 W2/W3
                      + (256 + 128 + 64 + 64 + 1) * 4                 # biases + w4
                      + B * 4)                                        # output

    out = pl.pallas_call(
        _fused_forward_kernel,
        out_shape=jax.ShapeDtypeStruct((1, B), jnp.float32),
        grid=(num_tiles,),
        in_specs=[
            batch_spec(3),                        # packed ids
            batch_spec(STATS_SIZE),               # stats
            resident_spec(t1w.shape),             # (24,256) fused type table
            resident_spec(a1w.shape),             # (64,256) fused ability table
            resident_spec(w1s.shape),             # (48,256) stats block of W1
            resident_spec(b1.shape),
            resident_spec(w2b.shape),
            resident_spec(b2.shape),
            resident_spec(w3b.shape),
            resident_spec(b3.shape),
            resident_spec(w4row.shape),           # (1,64) f32 final weight row
            pl.BlockSpec(memory_space=pltpu.MemorySpace.SMEM),   # (1,1) scalar bias
        ],
        out_specs=pl.BlockSpec((1, tile_b), lambda i: (0, i)),   # lane-dense output
        compiler_params=pltpu.CompilerParams(
            dimension_semantics=("parallel",),     # split batch tiles on v7x's 2 TCs
            vmem_limit_bytes=32 * 1024 * 1024),
        cost_estimate=pl.CostEstimate(flops=flops, transcendentals=2 * B,
                                      bytes_accessed=bytes_accessed),
    )(ids, stats, t1w, a1w, w1s, b1, w2b, b2, w3b, b3, w4row, b4s)

    return out.reshape(B, 1)


# ----------------------------------------------------------------------------
# Deterministic parameter construction (shapes from the nn.Module __init__)
# ----------------------------------------------------------------------------
def make_params(key):
    dims = [TOTAL_IN] + list(HIDDEN) + [1]
    keys = jax.random.split(key, 2 * (len(dims) - 1) + 2)
    params = []
    for li in range(len(dims) - 1):
        fan_in, fan_out = dims[li], dims[li + 1]
        bound = 1.0 / jnp.sqrt(jnp.float32(fan_in))
        w = jax.random.uniform(keys[2 * li], (fan_in, fan_out),
                               minval=-bound, maxval=bound, dtype=jnp.float32)
        b = jax.random.uniform(keys[2 * li + 1], (1, fan_out),
                               minval=-bound, maxval=bound, dtype=jnp.float32)
        params.append((w, b))

    # Stand-in embedding tables for the external `type_transformer`.
    type_emb = jax.random.normal(keys[-2], (TYPE_VOCAB, EMB_DIM),
                                 dtype=jnp.float32) * 0.1
    ability_emb = jax.random.normal(keys[-1], (ABILITY_VOCAB, EMB_DIM),
                                    dtype=jnp.float32) * 0.1
    return params, type_emb, ability_emb


# ----------------------------------------------------------------------------
# Pure-JAX reference (f32) for correctness checking
# ----------------------------------------------------------------------------
def reference_forward(type1_ids, type2_ids, ability_ids, stats,
                      mlp_params, type_emb, ability_emb):
    (w1, b1), (w2, b2), (w3, b3), (w4, b4) = mlp_params
    type_ids = jnp.concatenate([type1_ids, type2_ids], axis=1)       # (B, 2)
    t_emb = jnp.take(type_emb, type_ids, axis=0).mean(axis=1)        # (B, 16)
    a_emb = jnp.take(ability_emb, ability_ids[:, 0], axis=0)         # (B, 16)
    x = jnp.concatenate([t_emb, a_emb, stats], axis=1)               # (B, 80)
    h = jnp.maximum(x @ w1 + b1, 0.0)
    h = jnp.maximum(h @ w2 + b2, 0.0)
    h = jnp.maximum(h @ w3 + b3, 0.0)
    return jax.nn.sigmoid(h @ w4 + b4)


if __name__ == "__main__":
    key = jax.random.PRNGKey(0)
    k_par, k1, k2, k3, k4 = jax.random.split(key, 5)

    mlp_params, type_emb, ability_emb = make_params(k_par)

    B = 8
    type1_ids = jax.random.randint(k1, (B, 1), 0, TYPE_VOCAB, dtype=jnp.int32)
    type2_ids = jax.random.randint(k2, (B, 1), 0, TYPE_VOCAB, dtype=jnp.int32)
    ability_ids = jax.random.randint(k3, (B, 1), 0, ABILITY_VOCAB, dtype=jnp.int32)
    stats = jax.random.normal(k4, (B, STATS_SIZE), dtype=jnp.float32)

    out = pokemon_counter_predictor(type1_ids, type2_ids, ability_ids, stats,
                                    mlp_params, type_emb, ability_emb)
    out = jax.block_until_ready(out)

    ref = reference_forward(type1_ids, type2_ids, ability_ids, stats,
                            mlp_params, type_emb, ability_emb)

    assert out.shape == (B, 1)
    assert bool(jnp.all((out >= 0.0) & (out <= 1.0)))
    # bf16 MXU operands with f32 accumulation -> small deviation from f32 reference.
    assert bool(jnp.max(jnp.abs(out - ref)) < 5e-2), float(jnp.max(jnp.abs(out - ref)))
    print("KERNEL_OK")
</pallas_src>

<mosaic_0001>
module attributes {stable_mosaic.version = 11 : i64} {
  func.func @_fused_forward_kernel(%arg0: i32, %arg1: memref<8x3xi32, #tpu.memory_space<vmem>>, %arg2: memref<8x48xf32, #tpu.memory_space<vmem>>, %arg3: memref<24x256xbf16, #tpu.memory_space<vmem>>, %arg4: memref<64x256xbf16, #tpu.memory_space<vmem>>, %arg5: memref<48x256xbf16, #tpu.memory_space<vmem>>, %arg6: memref<1x256xf32, #tpu.memory_space<vmem>>, %arg7: memref<256x128xbf16, #tpu.memory_space<vmem>>, %arg8: memref<1x128xf32, #tpu.memory_space<vmem>>, %arg9: memref<128x64xbf16, #tpu.memory_space<vmem>>, %arg10: memref<1x64xf32, #tpu.memory_space<vmem>>, %arg11: memref<1x64xf32, #tpu.memory_space<vmem>>, %arg12: memref<1x1xf32, #tpu.memory_space<smem>>, %arg13: memref<1x8xf32, #tpu.memory_space<vmem>>) attributes {dimension_semantics = [#tpu.dimension_semantics<parallel>], iteration_bounds = array<i64: 1>, scalar_prefetch = 0 : i64, scratch_operands = 0 : i64, tpu.core_type = #tpu.core_type<tc>, window_params = [{transform_indices = @transform_0, window_bounds = array<i64: 8, 3>}, {transform_indices = @transform_1, window_bounds = array<i64: 8, 48>}, {pipeline_mode = #tpu.pipeline_mode<synchronous>, transform_indices = @transform_2, window_bounds = array<i64: 24, 256>}, {pipeline_mode = #tpu.pipeline_mode<synchronous>, transform_indices = @transform_3, window_bounds = array<i64: 64, 256>}, {pipeline_mode = #tpu.pipeline_mode<synchronous>, transform_indices = @transform_4, window_bounds = array<i64: 48, 256>}, {pipeline_mode = #tpu.pipeline_mode<synchronous>, transform_indices = @transform_5, window_bounds = array<i64: 1, 256>}, {pipeline_mode = #tpu.pipeline_mode<synchronous>, transform_indices = @transform_6, window_bounds = array<i64: 256, 128>}, {pipeline_mode = #tpu.pipeline_mode<synchronous>, transform_indices = @transform_7, window_bounds = array<i64: 1, 128>}, {pipeline_mode = #tpu.pipeline_mode<synchronous>, transform_indices = @transform_8, window_bounds = array<i64: 128, 64>}, {pipeline_mode = #tpu.pipeline_mode<synchronous>, transform_indices = @transform_9, window_bounds = array<i64: 1, 64>}, {pipeline_mode = #tpu.pipeline_mode<synchronous>, transform_indices = @transform_10, window_bounds = array<i64: 1, 64>}, {transform_indices = @transform_11, window_bounds = array<i64: 1, 1>}, {transform_indices = @transform_12, window_bounds = array<i64: 1, 8>}]} {
    %c0 = arith.constant 0 : index
    %c0_0 = arith.constant 0 : index
    %0 = vector.load %arg1[%c0, %c0_0] : memref<8x3xi32, #tpu.memory_space<vmem>>, vector<8x3xi32>
    %1 = vector.extract_strided_slice %0 {offsets = [0, 0], sizes = [8, 1], strides = [1, 1]} : vector<8x3xi32> to vector<8x1xi32>
    %2 = vector.extract_strided_slice %0 {offsets = [0, 1], sizes = [8, 1], strides = [1, 1]} : vector<8x3xi32> to vector<8x1xi32>
    %3 = vector.extract_strided_slice %0 {offsets = [0, 2], sizes = [8, 1], strides = [1, 1]} : vector<8x3xi32> to vector<8x1xi32>
    %4 = tpu.iota {dimensions = array<i32: 1>} : vector<8x24xi32>
    %5 = vector.broadcast %1 : vector<8x1xi32> to vector<8x24xi32>
    %6 = arith.cmpi eq, %4, %5 : vector<8x24xi32>
    %7 = arith.extui %6 : vector<8x24xi1> to vector<8x24xi32>
    %8 = arith.sitofp %7 : vector<8x24xi32> to vector<8x24xf32>
    %9 = arith.truncf %8 : vector<8x24xf32> to vector<8x24xbf16>
    %10 = vector.broadcast %2 : vector<8x1xi32> to vector<8x24xi32>
    %11 = arith.cmpi eq, %4, %10 : vector<8x24xi32>
    %12 = arith.extui %11 : vector<8x24xi1> to vector<8x24xi32>
    %13 = arith.sitofp %12 : vector<8x24xi32> to vector<8x24xf32>
    %14 = arith.truncf %13 : vector<8x24xf32> to vector<8x24xbf16>
    %15 = arith.addf %9, %14 : vector<8x24xbf16>
    %cst = arith.constant 5.000000e-01 : bf16
    %16 = vector.broadcast %cst : bf16 to vector<8x24xbf16>
    %17 = arith.mulf %15, %16 : vector<8x24xbf16>
    %18 = tpu.iota {dimensions = array<i32: 1>} : vector<8x64xi32>
    %19 = vector.broadcast %3 : vector<8x1xi32> to vector<8x64xi32>
    %20 = arith.cmpi eq, %18, %19 : vector<8x64xi32>
    %21 = arith.extui %20 : vector<8x64xi1> to vector<8x64xi32>
    %22 = arith.sitofp %21 : vector<8x64xi32> to vector<8x64xf32>
    %23 = arith.truncf %22 : vector<8x64xf32> to vector<8x64xbf16>
    %c0_1 = arith.constant 0 : index
    %c0_2 = arith.constant 0 : index
    %24 = vector.load %arg3[%c0_1, %c0_2] : memref<24x256xbf16, #tpu.memory_space<vmem>>, vector<24x256xbf16>
    %cst_3 = arith.constant dense<0.000000e+00> : vector<8x256xf32>
    %25 = tpu.matmul %17, %24, %cst_3 {dimension_numbers = #tpu.dot_dimension_numbers<[1], [0], [0], [1], [0, 0, 1, 1], [], []>} : vector<8x24xbf16>, vector<24x256xbf16>, vector<8x256xf32> -> vector<8x256xf32>
    %c0_4 = arith.constant 0 : index
    %c0_5 = arith.constant 0 : index
    %26 = vector.load %arg4[%c0_4, %c0_5] : memref<64x256xbf16, #tpu.memory_space<vmem>>, vector<64x256xbf16>
    %cst_6 = arith.constant dense<0.000000e+00> : vector<8x256xf32>
    %27 = tpu.matmul %23, %26, %cst_6 {dimension_numbers = #tpu.dot_dimension_numbers<[1], [0], [0], [1], [0, 0, 1, 1], [], []>} : vector<8x64xbf16>, vector<64x256xbf16>, vector<8x256xf32> -> vector<8x256xf32>
    %28 = arith.addf %25, %27 : vector<8x256xf32>
    %c0_7 = arith.constant 0 : index
    %c0_8 = arith.constant 0 : index
    %29 = vector.load %arg2[%c0_7, %c0_8] : memref<8x48xf32, #tpu.memory_space<vmem>>, vector<8x48xf32>
    %30 = arith.truncf %29 : vector<8x48xf32> to vector<8x48xbf16>
    %c0_9 = arith.constant 0 : index
    %c0_10 = arith.constant 0 : index
    %31 = vector.load %arg5[%c0_9, %c0_10] : memref<48x256xbf16, #tpu.memory_space<vmem>>, vector<48x256xbf16>
    %cst_11 = arith.constant dense<0.000000e+00> : vector<8x256xf32>
    %32 = tpu.matmul %30, %31, %cst_11 {dimension_numbers = #tpu.dot_dimension_numbers<[1], [0], [0], [1], [0, 0, 1, 1], [], []>} : vector<8x48xbf16>, vector<48x256xbf16>, vector<8x256xf32> -> vector<8x256xf32>
    %33 = arith.addf %28, %32 : vector<8x256xf32>
    %c0_12 = arith.constant 0 : index
    %c0_13 = arith.constant 0 : index
    %34 = vector.load %arg6[%c0_12, %c0_13] : memref<1x256xf32, #tpu.memory_space<vmem>>, vector<1x256xf32>
    %35 = vector.broadcast %34 : vector<1x256xf32> to vector<8x256xf32>
    %36 = arith.addf %33, %35 : vector<8x256xf32>
    %cst_14 = arith.constant 0.000000e+00 : f32
    %37 = vector.broadcast %cst_14 : f32 to vector<8x256xf32>
    %38 = arith.maximumf %36, %37 : vector<8x256xf32>
    %39 = arith.truncf %38 : vector<8x256xf32> to vector<8x256xbf16>
    %c0_15 = arith.constant 0 : index
    %c0_16 = arith.constant 0 : index
    %40 = vector.load %arg7[%c0_15, %c0_16] : memref<256x128xbf16, #tpu.memory_space<vmem>>, vector<256x128xbf16>
    %cst_17 = arith.constant dense<0.000000e+00> : vector<8x128xf32>
    %41 = tpu.matmul %39, %40, %cst_17 {dimension_numbers = #tpu.dot_dimension_numbers<[1], [0], [0], [1], [0, 0, 1, 1], [], []>} : vector<8x256xbf16>, vector<256x128xbf16>, vector<8x128xf32> -> vector<8x128xf32>
    %c0_18 = arith.constant 0 : index
    %c0_19 = arith.constant 0 : index
    %42 = vector.load %arg8[%c0_18, %c0_19] : memref<1x128xf32, #tpu.memory_space<vmem>>, vector<1x128xf32>
    %43 = vector.broadcast %42 : vector<1x128xf32> to vector<8x128xf32>
    %44 = arith.addf %41, %43 : vector<8x128xf32>
    %cst_20 = arith.constant 0.000000e+00 : f32
    %45 = vector.broadcast %cst_20 : f32 to vector<8x128xf32>
    %46 = arith.maximumf %44, %45 : vector<8x128xf32>
    %47 = arith.truncf %46 : vector<8x128xf32> to vector<8x128xbf16>
    %c0_21 = arith.constant 0 : index
    %c0_22 = arith.constant 0 : index
    %48 = vector.load %arg9[%c0_21, %c0_22] : memref<128x64xbf16, #tpu.memory_space<vmem>>, vector<128x64xbf16>
    %cst_23 = arith.constant dense<0.000000e+00> : vector<8x64xf32>
    %49 = tpu.matmul %47, %48, %cst_23 {dimension_numbers = #tpu.dot_dimension_numbers<[1], [0], [0], [1], [0, 0, 1, 1], [], []>} : vector<8x128xbf16>, vector<128x64xbf16>, vector<8x64xf32> -> vector<8x64xf32>
    %c0_24 = arith.constant 0 : index
    %c0_25 = arith.constant 0 : index
    %50 = vector.load %arg10[%c0_24, %c0_25] : memref<1x64xf32, #tpu.memory_space<vmem>>, vector<1x64xf32>
    %51 = vector.broadcast %50 : vector<1x64xf32> to vector<8x64xf32>
    %52 = arith.addf %49, %51 : vector<8x64xf32>
    %cst_26 = arith.constant 0.000000e+00 : f32
    %53 = vector.broadcast %cst_26 : f32 to vector<8x64xf32>
    %54 = arith.maximumf %52, %53 : vector<8x64xf32>
    %c0_27 = arith.constant 0 : index
    %c0_28 = arith.constant 0 : index
    %55 = vector.load %arg11[%c0_27, %c0_28] : memref<1x64xf32, #tpu.memory_space<vmem>>, vector<1x64xf32>
    %56 = vector.broadcast %55 : vector<1x64xf32> to vector<8x64xf32>
    %57 = arith.mulf %54, %56 : vector<8x64xf32>
    %cst_29 = arith.constant dense<0.000000e+00> : vector<8xf32>
    %58 = vector.multi_reduction <add>, %57, %cst_29 [1] : vector<8x64xf32> to vector<8xf32>
    %c0_30 = arith.constant 0 : index
    %c0_31 = arith.constant 0 : index
    %59 = memref.load %arg12[%c0_30, %c0_31] : memref<1x1xf32, #tpu.memory_space<smem>>
    %60 = vector.broadcast %59 : f32 to vector<8xf32>
    %61 = arith.addf %58, %60 : vector<8xf32>
    %62 = arith.negf %61 : vector<8xf32>
    %63 = math.exp %62 : vector<8xf32>
    %cst_32 = arith.constant 1.000000e+00 : f32
    %64 = vector.broadcast %cst_32 : f32 to vector<8xf32>
    %65 = arith.addf %64, %63 : vector<8xf32>
    %66 = arith.divf %64, %65 : vector<8xf32>
    %67 = vector.shape_cast %66 : vector<8xf32> to vector<1x8xf32>
    %c0_33 = arith.constant 0 : index
    %c0_34 = arith.constant 0 : index
    %68 = vector.load %arg13[%c0_33, %c0_34] : memref<1x8xf32, #tpu.memory_space<vmem>>, vector<1x8xf32>
    tpu.vector_store %arg13[%c0_33, %c0_34], %67 {strides = array<i32>} : memref<1x8xf32, #tpu.memory_space<vmem>>, vector<1x8xf32>,
    return
  }
  func.func @transform_0(%arg0: i32) -> (i32, i32) {
    %c0_i32 = arith.constant 0 : i32
    %c0_i32_0 = arith.constant 0 : i32
    return %arg0, %c0_i32 : i32, i32
  }
  func.func @transform_1(%arg0: i32) -> (i32, i32) {
    %c0_i32 = arith.constant 0 : i32
    %c0_i32_0 = arith.constant 0 : i32
    return %arg0, %c0_i32 : i32, i32
  }
  func.func @transform_2(%arg0: i32) -> (i32, i32) {
    %c0_i32 = arith.constant 0 : i32
    %c0_i32_0 = arith.constant 0 : i32
    %c0_i32_1 = arith.constant 0 : i32
    return %c0_i32, %c0_i32_0 : i32, i32
  }
  func.func @transform_3(%arg0: i32) -> (i32, i32) {
    %c0_i32 = arith.constant 0 : i32
    %c0_i32_0 = arith.constant 0 : i32
    %c0_i32_1 = arith.constant 0 : i32
    return %c0_i32, %c0_i32_0 : i32, i32
  }
  func.func @transform_4(%arg0: i32) -> (i32, i32) {
    %c0_i32 = arith.constant 0 : i32
    %c0_i32_0 = arith.constant 0 : i32
    %c0_i32_1 = arith.constant 0 : i32
    return %c0_i32, %c0_i32_0 : i32, i32
  }
  func.func @transform_5(%arg0: i32) -> (i32, i32) {
    %c0_i32 = arith.constant 0 : i32
    %c0_i32_0 = arith.constant 0 : i32
    %c0_i32_1 = arith.constant 0 : i32
    return %c0_i32, %c0_i32_0 : i32, i32
  }
  func.func @transform_6(%arg0: i32) -> (i32, i32) {
    %c0_i32 = arith.constant 0 : i32
    %c0_i32_0 = arith.constant 0 : i32
    %c0_i32_1 = arith.constant 0 : i32
    return %c0_i32, %c0_i32_0 : i32, i32
  }
  func.func @transform_7(%arg0: i32) -> (i32, i32) {
    %c0_i32 = arith.constant 0 : i32
    %c0_i32_0 = arith.constant 0 : i32
    %c0_i32_1 = arith.constant 0 : i32
    return %c0_i32, %c0_i32_0 : i32, i32
  }
  func.func @transform_8(%arg0: i32) -> (i32, i32) {
    %c0_i32 = arith.constant 0 : i32
    %c0_i32_0 = arith.constant 0 : i32
    %c0_i32_1 = arith.constant 0 : i32
    return %c0_i32, %c0_i32_0 : i32, i32
  }
  func.func @transform_9(%arg0: i32) -> (i32, i32) {
    %c0_i32 = arith.constant 0 : i32
    %c0_i32_0 = arith.constant 0 : i32
    %c0_i32_1 = arith.constant 0 : i32
    return %c0_i32, %c0_i32_0 : i32, i32
  }
  func.func @transform_10(%arg0: i32) -> (i32, i32) {
    %c0_i32 = arith.constant 0 : i32
    %c0_i32_0 = arith.constant 0 : i32
    %c0_i32_1 = arith.constant 0 : i32
    return %c0_i32, %c0_i32_0 : i32, i32
  }
  func.func @transform_11(%arg0: i32) -> (i32, i32) {
    %c0_i32 = arith.constant 0 : i32
    %c0_i32_0 = arith.constant 0 : i32
    %c0_i32_1 = arith.constant 0 : i32
    return %c0_i32, %c0_i32_0 : i32, i32
  }
  func.func @transform_12(%arg0: i32) -> (i32, i32) {
    %c0_i32 = arith.constant 0 : i32
    %c0_i32_0 = arith.constant 0 : i32
    return %c0_i32, %arg0 : i32, i32
  }
}

</mosaic_0001>

<bundles_post_ra>
// kernel: tpu_custom_call.1
= control target key start
LH: loop header
LB: loop body
LE: loop exit
PB: predicated region body
PF: predicated region fallthrough
CT: control target
= control target key end

     0   :  { %18 = vsyncpa [#allocation4], 0  ;;  %s1175_s0 = inlined_call_operand.vmem [shape: s32[8,3], index: 0, kind: input, shape index: {}]   ;;  %s1176_s1 = inlined_call_operand.hbm [shape: f32[8,48], index: 1, kind: input, shape index: {}]   ;;  %s1177_s2 = inlined_call_operand.hbm [shape: bf16[24,256], index: 2, kind: input, shape index: {}]   ;;  %s1178_s3 = inlined_call_operand.vmem [shape: bf16[64,256], index: 3, kind: input, shape index: {}]   ;;  %s1179_s4 = inlined_call_operand.vmem [shape: bf16[48,256], index: 4, kind: input, shape index: {}]   ;;  %s1180_s5 = inlined_call_operand.vmem [shape: f32[1,256], index: 5, kind: input, shape index: {}]   ;;  %s1181_s6 = inlined_call_operand.hbm [shape: bf16[256,128], index: 6, kind: input, shape index: {}]   ;;  %s1182_s7 = inlined_call_operand.vmem [shape: f32[1,128], index: 7, kind: input, shape index: {}]   ;;  %s1183_s8 = inlined_call_operand.vmem [shape: bf16[128,64], index: 8, kind: input, shape index: {}]   ;;  %s1184_s9 = inlined_call_operand.vmem [shape: f32[1,64], index: 9, kind: input, shape index: {}]   ;;  %s1185_s10 = inlined_call_operand.vmem [shape: f32[1,64], index: 10, kind: input, shape index: {}]   ;;  %s1186_s11 = inlined_call_operand.<no memory space> [shape: f32[1,1], index: 11, kind: input, shape index: {}]   ;;  %s1187_s12 = inlined_call_operand.hbm [shape: f32[1,8], index: 12, kind: output, shape index: {}]  }
   0x1   :  { %19 = vsyncpa [#allocation7], 0 }
   0x2   :  { %20 = vsyncpa [#allocation5], 0  ;;  %s970_s21 = smov [#allocation6]  }
   0x3   :  { %s38_s22 = sshll.u32 %s970_s21, 4  ;;  %s39_s22 = int_to_ptr.vmem [resolvable:$true] %s38_s22 }
   0x4   :  { %s892_s23 = scalar_lea.vmem %s39_s22, 384  ;;  %p897_p1 = scmp.lt.s32.totalorder %s39_s22, %s39_s22 }
   0x5   :  { %p893_p0 = scmp.ne.s32.totalorder %s39_s22, %s892_s23  ;;  %p898_p2 = scmp.lt.s32.totalorder %s892_s23, %s892_s23 }
   0x7   :  { %p899_p3 = por %p898_p2, %p897_p1 }
   0x9   :  { %p900_p4 = pnand %p899_p3, %p893_p0 }
   0xb   :  { %903 = shalt.err (!%p900_p4)
}
   0xc   :  { %s971_s24 = smov 128   ;;  %s972_s25 = smov 8  }
   0xd   :  { %44 = dma.hbm_to_vmem [thread:$0]  %s1177_s2, 384, %s39_s22, [#allocation7], %s971_s24, %s971_s24, %s972_s25  }
   0xe   :  { %s973_s28 = smov [#allocation3]   ;;  %s974_s30 = smov [#allocation8]  }
   0xf   :  { %s29_s29 = sshll.u32 %s973_s28, 4  ;;  %s56_s13 = sshll.u32 %s974_s30, 4  ;;  %s30_s29 = int_to_ptr.vmem [resolvable:$true] %s29_s29  ;;  %s57_s13 = int_to_ptr.vmem [resolvable:$true] %s56_s13 }
  0x10   :  { %s912_s14 = scalar_lea.vmem %s30_s29, 128  ;;  %p917_p6 = scmp.lt.s32.totalorder %s30_s29, %s30_s29 }
  0x11   :  { %p913_p5 = scmp.ne.s32.totalorder %s30_s29, %s912_s14  ;;  %p918_p7 = scmp.lt.s32.totalorder %s912_s14, %s912_s14 }
  0x13   :  { %p919_p8 = por %p918_p7, %p917_p6 }
  0x15   :  { %p920_p9 = pnand %p919_p8, %p913_p5 }
  0x17   :  { %923 = shalt.err (!%p920_p9)
}
  0x18   :  { %32 = dma.hbm_to_vmem [thread:$0]  %s1176_s1, 128, %s30_s29, [#allocation4]  }
  0x19   :  { %s932_s17 = scalar_lea.vmem %s57_s13, 2048  ;;  %p937_p11 = scmp.lt.s32.totalorder %s57_s13, %s57_s13 }
  0x1a   :  { %p933_p10 = scmp.ne.s32.totalorder %s57_s13, %s932_s17  ;;  %p938_p12 = scmp.lt.s32.totalorder %s932_s17, %s932_s17 }
  0x1c   :  { %p939_p13 = por %p938_p12, %p937_p11 }
  0x1e   :  { %p940_p0 = pnand %p939_p13, %p933_p10 }
  0x20   :  { %943 = shalt.err (!%p940_p0)
}
  0x21   :  { %s975_s2 = smov 64   ;;  %s976_s18 = smov 4  }
  0x22   :  { %62 = dma.hbm_to_vmem [thread:$0]  %s1181_s6, 2048, %s57_s13, [#allocation7], %s975_s2, %s975_s2, %s976_s18  }
  0x23   :  { %964 = dma.done.wait [#allocation4], 128  }
  0x24   :  { %965 = vsyncadd [#allocation4], 4294967168 }
  0x25   :  { %966 = dma.done.wait [#allocation7], 2432  }
  0x26   :  { %967 = vsyncadd [#allocation7], 4294964864  ;;  %v977_v0 = vmov 0   ;;  %v978_v1 = vmov 2   ;;  %v84_v2 = vld [vmem:[%s1175_s0] sm:$0xff]  ;;  %v112_v6 = vld [vmem:[#allocation6 + $0x10] sm:$0xff]  ;;  %v85_v20 = vlaneseq }
  0x27   :  { %826 = vset.pattern.permute.xlu0 %v977_v0  ;;  %828 = vset.pattern.permute.xlu1 %v978_v1  ;;  %v830_v3 = vld [vmem:[%s1178_s3 + $0x34] ss:$8 sps:$4 sm:$0xff]   ;;  %v832_v4 = vld [vmem:[%s1178_s3 + $0x30] ss:$8 sps:$4 sm:$0xff]   ;;  %v833_v5 = vld [vmem:[%s1178_s3 + $0x24] ss:$8 sps:$4 sm:$0xff]   ;;  %v724_v8 = vcombine.high %v112_v6, %v112_v6  ;;  %v723_v10 = vcombine.low %v112_v6, %v112_v6 }
  0x28   :  { %197 = vmatprep.mubr.bf16.mxu0 %v977_v0  ;;  %264 = vmatprep.mubr.bf16.mxu1 %v977_v0  ;;  %vm225_vm0 = vcmask 1043456   ;;  %v835_v7 = vld [vmem:[%s1178_s3 + $0x20] ss:$8 sps:$4 sm:$0xff]   ;;  %v837_v9 = vld [vmem:[%s1178_s3 + $0x14] ss:$8 sps:$4 sm:$0xff]   ;;  %v979_v11 = vmov 1  }
  0x29   :  { %88 = vperm.xlu0 %826, %v84_v2   ;;  %104 = vperm.xlu1 %828, %v84_v2   ;;  %v841_v12 = vld [vmem:[#allocation6 + $0x4] ss:$8 sps:$4 sm:$0xff]   ;;  %v227_v13 = vsel %vm225_vm0, %v723_v10, 0  ;;  %v845_v14 = vld [vmem:[#allocation6] ss:$8 sps:$4 sm:$0xff]   ;;  %v856_v19 = vld [vmem:[#allocation8 + $0x78] sm:$0xff]  }
  0x2a   :  { %173 = vmatprep.subr.bf16.mxu0 %v830_v3  ;;  %725 = vmatprep.subr.msk.bf16.mxu1 %vm225_vm0, %v724_v8  ;;  %v840_v15 = vld [vmem:[%s1178_s3 + $0x10] ss:$8 sps:$4 sm:$0xff]   ;;  %v843_v16 = vld [vmem:[%s1178_s3 + $0x4] ss:$8 sps:$4 sm:$0xff]   ;;  %v846_v18 = vld [vmem:[%s1178_s3] ss:$8 sps:$4 sm:$0xff]  }
  0x2b   :  { %174 = vmatpush1.bf16.msra.mxu0 %v832_v4  ;;  %245 = vmatpush1.bf16.msra.mxu1 %v227_v13  ;;  %v849_v17 = vld [vmem:[%s1179_s4 + $0x24] ss:$8 sps:$4 sm:$0xff]   ;;  %v1091_v21 = vand.u32 127, %v85_v20  ;;  %v980_v24 = vmov 0.0   ;;  %vm161_vm3 = vcmask 523264   ;;  %v857_v26 = vld [vmem:[#allocation8 + $0x38] sm:$0xff]  }
  0x2c   :  { %175 = vmatprep.subr.bf16.mxu0 %v833_v5  ;;  %246 = vmatprep.subr.bf16.mxu1 %v841_v12  ;;  %v858_v28 = vld [vmem:[#allocation8 + $0x70] sm:$0xff]   ;;  %v860_v33 = vld [vmem:[#allocation8 + $0x68] sm:$0xff]   ;;  %vm221_vm5 = vcmask 195584   ;;  %v273_v43 = vld [vmem:[#allocation3] sm:$0xff]  ;;  %vm311_vm6 = vcmask 392192   ;;  %v1138_v3 = vshrl.u32 %v85_v20, 7 }
  0x2d   :  { %827 = vset.pattern.permute.xlu0 %v979_v11  ;;  %v859_v31 = vld [vmem:[#allocation8 + $0x30] sm:$0xff]   ;;  %v847_v37 = vld [vmem:[%s1179_s4 + $0x20] ss:$8 sps:$4 sm:$0xff]   ;;  %v855_v41 = vld [vmem:[%s1179_s4 + $0x4] ss:$8 sps:$4 sm:$0xff]   ;;  %v274_v44 = vpack.c.bf16 %v273_v43, %v273_v43  ;;  %vm981_vm7 = vmmov 0  }
  0x2e   :  { %95 = vperm.xlu0 %827, %v84_v2   ;;  %v852_v39 = vld [vmem:[%s1179_s4 + $0x14] ss:$8 sps:$4 sm:$0xff]   ;;  %v850_v40 = vld [vmem:[%s1179_s4 + $0x10] ss:$8 sps:$4 sm:$0xff]   ;;  %v853_v42 = vld [vmem:[%s1179_s4] ss:$8 sps:$4 sm:$0xff]  }
  0x2f   :  { %176 = vmatpush1.bf16.msra.mxu0 %v835_v7  ;;  %247 = vmatpush1.bf16.msra.mxu1 %v845_v14  ;;  %v861_v45 = vld [vmem:[#allocation8 + $0x28] sm:$0xff]   ;;  %v862_v46 = vld [vmem:[#allocation8 + $0x60] sm:$0xff]   ;;  %v864_v48 = vld [vmem:[#allocation8 + $0x58] sm:$0xff]   ;;  %v362_v6 = vsub.s32 0, %v1138_v3  ;;  %v366_v8 = vsub.s32 1, %v1138_v3  ;;  %vm691_vm8 = vcmask 57344  }
  0x30   :  { %177 = vmatprep.subr.bf16.mxu0 %v837_v9  ;;  %325 = vmatprep.subr.bf16.mxu1 %v849_v17  ;;  %v863_v47 = vld [vmem:[#allocation8 + $0x20] sm:$0xff]   ;;  %v865_v49 = vld [vmem:[#allocation8 + $0x18] sm:$0xff]   ;;  %v866_v50 = vld [vmem:[#allocation8 + $0x50] sm:$0xff]  }
  0x31   :  { %v867_v51 = vld [vmem:[#allocation8 + $0x10] sm:$0xff]   ;;  %v868_v52 = vld [vmem:[#allocation8 + $0x48] sm:$0xff]   ;;  %v870_v54 = vld [vmem:[#allocation8 + $0x40] sm:$0xff]  }
  0x32   :  { %829 = vset.pattern.permute.xlu0 %v978_v1  ;;  %v869_v53 = vld [vmem:[#allocation8 + $0x8] sm:$0xff]   ;;  %v871_v55 = vld [vmem:[#allocation8] sm:$0xff]   ;;  %v872_v56 = vld [vmem:[%s1183_s8 + $0x38] sm:$0xff]  }
  0x33   :  { %178 = vmatpush1.bf16.msra.mxu0 %v840_v15  ;;  %v873_v57 = vld [vmem:[%s1183_s8 + $0x30] sm:$0xff]   ;;  %v874_v58 = vld [vmem:[%s1183_s8 + $0x28] sm:$0xff]   ;;  %v875_v59 = vld [vmem:[%s1183_s8 + $0x20] sm:$0xff]  }
  0x34   :  { %179 = vmatprep.subr.bf16.mxu0 %v843_v16  ;;  %v876_v60 = vld [vmem:[%s1183_s8 + $0x18] sm:$0xff]   ;;  %v358_v7 = vld [vmem:[%s1180_s5] sm:$0x3] }
  0x35   :  { %v363_v10 = vrot.slane %v358_v7, %v362_v6  ;;  %v367_v14 = vrot.slane %v358_v7, %v366_v8 }
  0x37   :  { %180 = vmatpush1.bf16.msra.mxu0 %v846_v18 }
  0x38   :  { %762 = vmatprep.subr.bf16.mxu0 %v856_v19 }
  0xa4   :  { %v89_v22 = vpop.permute.xlu0 %88  ;;  %v105_v23 = vpop.permute.xlu1 %104 }
  0xa5   :  { %vm106_vm1 = vcmp.eq.s32.totalorder %v1091_v21, %v105_v23  ;;  %vm90_vm2 = vcmp.eq.s32.totalorder %v1091_v21, %v89_v22 }
  0xa6   :  { %v711_v25 = vsel %vm106_vm1, 1.0, %v980_v24  ;;  %v709_v29 = vsel %vm90_vm2, 1.0, %v980_v24 }
  0xa7   :  { %v109_v27 = vpack.c.bf16 %v711_v25, %v711_v25  ;;  %v93_v34 = vpack.c.bf16 %v709_v29, %v709_v29  ;;  %v879_v29 = vld [vmem:[%s1183_s8] sm:$0xff]  }
  0xa9   :  { %v96_v30 = vpop.permute.xlu0 %95  ;;  %720 = vmatmul.mubr.msk.bf16.vlgmr.msra.gmra.mxu0 %vm161_vm3, %v109_v27  ;;  %v877_v27 = vld [vmem:[%s1183_s8 + $0x10] sm:$0xff]  }
  0xaa   :  { %vm97_vm4 = vcmp.eq.s32.totalorder %v1091_v21, %v96_v30  ;;  %763 = vmatpush3.bf16.msra.mxu0 %v857_v26 }
  0xab   :  { %v710_v32 = vsel %vm97_vm4, 1.0, %v980_v24  ;;  %764 = vmatprep.subr.bf16.mxu0 %v858_v28  ;;  %v878_v28 = vld [vmem:[%s1183_s8 + $0x8] sm:$0xff]  }
  0xac   :  { %v100_v35 = vpack.c.bf16 %v710_v32, %v710_v32 }
  0xae   :  { %v101_v36 = vadd.bf16 %v100_v35, %v93_v34  ;;  %765 = vmatpush3.bf16.msra.mxu0 %v859_v31  ;;  %v734_v31 = vld [vmem:[%s1182_s7] ss:$0 sm:$0xff] }
  0xaf   :  { %766 = vmatprep.subr.bf16.mxu0 %v860_v33 }
  0xb0   :  { %v102_v38 = vmul.bf16 1056980736, %v101_v36 }
  0xb2   :  { %726 = vmatmul.mubr.msk.bf16.vlgmr.msra.gmra.mxu1 %vm221_vm5, %v102_v38  ;;  %767 = vmatpush3.bf16.msra.mxu0 %v861_v45 }
  0xb3   :  { %326 = vmatpush1.bf16.msra.mxu1 %v847_v37  ;;  %347 = vmatprep.mubr.bf16.mxu1 %v977_v0 }
  0xb4   :  { %327 = vmatprep.subr.bf16.mxu1 %v852_v39  ;;  %768 = vmatprep.subr.bf16.mxu0 %v862_v46  ;;  %v751_v39 = vld [vmem:[%s1184_s9] ss:$0 sm:$0xff]  ;;  %s982_s9 = smov [#allocation9]  }
  0xb6   :  { %769 = vmatpush3.bf16.msra.mxu0 %v863_v47 }
  0xb7   :  { %328 = vmatpush1.bf16.msra.mxu1 %v850_v40  ;;  %770 = vmatprep.subr.bf16.mxu0 %v864_v48  ;;  %v677_v48 = vstv %s1186_s11 }
  0xb8   :  { %329 = vmatprep.subr.bf16.mxu1 %v855_v41 }
  0xba   :  { %771 = vmatpush3.bf16.msra.mxu0 %v865_v49 }
  0xbb   :  { %330 = vmatpush1.bf16.msra.mxu1 %v853_v42  ;;  %772 = vmatprep.subr.bf16.mxu0 %v866_v50  ;;  %v760_v42 = vld [vmem:[%s1185_s10] ss:$0 sm:$0xff]  ;;  %s699_s10 = sshll.u32 %s982_s9, 4  ;;  %s700_s10 = int_to_ptr.vmem [resolvable:$true] %s699_s10 }
  0xbc   :  { %793 = vmatprep.subr.bf16.mxu1 %v980_v24  ;;  %s944_s25 = scalar_lea.vmem %s700_s10, 16  ;;  %s948_s11 = scalar_lea.vmem %s700_s10, 32 }
  0xbd   :  { %p945_p1 = scmp.ne.s32.totalorder %s700_s10, %s944_s25  ;;  %p949_p2 = scmp.lt.s32.totalorder %s700_s10, %s700_s10 }
  0xbe   :  { %733 = vmatmul.mubr.msk.bf16.vlgmr.msra.gmra.mxu1 %vm311_vm6, %v274_v44  ;;  %773 = vmatpush3.bf16.msra.mxu0 %v867_v51  ;;  %p950_p3 = scmp.lt.s32.totalorder %s948_s11, %s944_s25 }
  0xbf   :  { %774 = vmatprep.subr.bf16.mxu0 %v868_v52  ;;  %794 = vmatpush3.bf16.msra.mxu1 %v872_v56 }
  0xc0   :  { %795 = vmatprep.subr.bf16.mxu1 %v980_v24  ;;  %809 = vmatprep.mubr.msk.bf16.mxu1 %vm981_vm7, %v980_v24  ;;  %p951_p4 = por %p950_p3, %p949_p2 }
  0xc2   :  { %775 = vmatpush3.bf16.msra.mxu0 %v869_v53  ;;  %p952_p5 = pnand %p951_p4, %p945_p1 }
  0xc3   :  { %776 = vmatprep.subr.bf16.mxu0 %v870_v54  ;;  %796 = vmatpush3.bf16.msra.mxu1 %v873_v57  ;;  %v688_v54 = vsub.s32 %v1091_v21, %v1138_v3 }
  0xc4   :  { %797 = vmatprep.subr.bf16.mxu1 %v980_v24 }
  0xc6   :  { %777 = vmatpush3.bf16.msra.mxu0 %v871_v55 }
  0xc7   :  { %798 = vmatpush3.bf16.msra.mxu1 %v874_v58 }
  0xc8   :  { %799 = vmatprep.subr.bf16.mxu1 %v980_v24 }
  0xcb   :  { %800 = vmatpush3.bf16.msra.mxu1 %v875_v59 }
  0xcc   :  { %801 = vmatprep.subr.bf16.mxu1 %v980_v24 }
  0xcf   :  { %802 = vmatpush3.bf16.msra.mxu1 %v876_v60 }
  0xd0   :  { %803 = vmatprep.subr.bf16.mxu1 %v980_v24 }
  0xd3   :  { %804 = vmatpush3.bf16.msra.mxu1 %v877_v27 }
  0xd4   :  { %805 = vmatprep.subr.bf16.mxu1 %v980_v24 }
  0xd7   :  { %806 = vmatpush3.bf16.msra.mxu1 %v878_v28 }
  0xd8   :  { %807 = vmatprep.subr.bf16.mxu1 %v980_v24 }
  0xdb   :  { %808 = vmatpush3.bf16.msra.mxu1 %v879_v29 }
 0x169   :  { %v199_v61 = vpop.f32.mrf.mxu0 }
 0x16b   :  { %v201_v62 = vpop.f32.mrf.mxu0 }
 0x16d   :  { %v203_v63 = vpop.f32.mrf.mxu0 }
 0x16f   :  { %v204_v0 = vpop.f32.mrf.mxu0 }
 0x172   :  { %v266_v1 = vpop.f32.mrf.mxu1 }
 0x173   :  { %v267_v9 = vadd.f32 %v266_v1, %v199_v61 }
 0x174   :  { %v268_v2 = vpop.f32.mrf.mxu1 }
 0x175   :  { %v269_v12 = vadd.f32 %v268_v2, %v201_v62 }
 0x176   :  { %v270_v4 = vpop.f32.mrf.mxu1 }
 0x178   :  { %v271_v5 = vpop.f32.mrf.mxu1 }
 0x17e   :  { %v349_v11 = vpop.f32.mrf.mxu1 }
 0x17f   :  { %v356_v13 = vadd.f32 %v349_v11, %v267_v9 }
 0x180   :  { %v351_v15 = vpop.f32.mrf.mxu1 }
 0x181   :  { %v370_v16 = vadd.f32 %v363_v10, %v356_v13  ;;  %v357_v17 = vadd.f32 %v351_v15, %v269_v12 }
 0x182   :  { %v353_v18 = vpop.f32.mrf.mxu1 }
 0x183   :  { %v371_v19 = vadd.f32 %v367_v14, %v357_v17  ;;  %v372_v20 = vmax.f32 %v370_v16, 0.0 }
 0x184   :  { %v354_v22 = vpop.f32.mrf.mxu1 }
 0x185   :  { %v373_v23 = vmax.f32 %v371_v19, 0.0  ;;  %v374_v26 = vpack.c.bf16 %v372_v20, %v372_v20 }
 0x187   :  { %v375_v25 = vpack.c.bf16 %v373_v23, %v373_v23 }
 0x189   :  { %543 = vmatprep.mubr.bf16.mxu0 %v375_v25 }
 0x18a   :  { %544 = vmatmul.mubr.bf16.vlgmr.msra.gmra.mxu0 %v374_v26 }
 0x24a   :  { %v778_v30 = vpop.f32.mrf.mxu0 }
 0x24c   :  { %v779_v32 = vpop.f32.mrf.mxu0 }
 0x24d   :  { %v780_v33 = vadd.f32 %v779_v32, %v778_v30 }
 0x24e   :  { %v781_v34 = vpop.f32.mrf.mxu0 }
 0x24f   :  { %v546_v35 = vadd.f32 %v780_v33, %v734_v31 }
 0x250   :  { %v782_v36 = vpop.f32.mrf.mxu0 }
 0x251   :  { %v551_v37 = vmax.f32 %v546_v35, 0.0 }
 0x253   :  { %v552_v38 = vpack.c.bf16 %v551_v37, %v551_v37 }
 0x255   :  { %810 = vmatmul.mubr.bf16.vlgmr.msra.gmra.mxu1 %v552_v38 }
 0x315   :  { %v658_v40 = vpop.f32.mrf.mxu1 }
 0x316   :  { %v659_v41 = vadd.f32 %v751_v39, %v658_v40 }
 0x317   :  { %v811_v24 = vpop.f32.mrf.mxu1 }
 0x318   :  { %v664_v43 = vmax.f32 %v659_v41, 0.0 }
 0x319   :  { %v661_v44 = vpop.f32.mrf.mxu1 }
 0x31a   :  { %v672_v45 = vmul.f32 %v760_v42, %v664_v43 }
 0x31b   :  { %v812_v46 = vpop.f32.mrf.mxu1 }
 0x31c   :  { %v673_v47 = vsel %vm161_vm3, %v672_v45, 0.0 }
 0x31d   :  { %674 = vadd.xlane.f32.xlu1 %v673_v47 }
 0x3a6   :  { %v675_v49 = vpop.xlane.xlu1 %674 }
 0x3a7   :  { %v678_v50 = vadd.f32 %v677_v48, %v675_v49 }
 0x3a9   :  { %v761_v51 = vmul.f32 -1.442695, %v678_v50 }
 0x3ab   :  { %880 = vpow2.f32 %v761_v51 }
 0x3b8   :  { %v881_v52 = vpop.eup %880 }
 0x3b9   :  { %v682_v53 = vadd.f32 1.0, %v881_v52 }
 0x3bb   :  { %882 = vrcp.f32 %v682_v53 }
 0x3c8   :  { %v883_v55 = vpop.eup %882 }
 0x3c9   :  { %v689_v56 = vrot.slane %v883_v55, %v688_v54 }
 0x3cb   :  { %692 = vst.msk [vmem:[#allocation9] sm:$0x1] %vm691_vm8, %v689_v56 }
 0x3cc   :  { %955 = shalt.err (!%p952_p5)
}
 0x3cd   :  { %702 = dma.vmem_to_hbm [thread:$0]  %s700_s10, 16, %s1187_s12, [#allocation5]  }
 0x3ce   :  { %968 = dma.done.wait [#allocation5], 16  }
 0x3cf   :  { %969 = vsyncadd [#allocation5], 4294967280 }
 0x3d0   :  { %706 = vsyncpa [#allocation4], 1 }
 0x3d1   :  { %707 = vsyncpa [#allocation7], 1 }
 0x3d2   :  { %708 = vsyncpa [#allocation5], 1 }

</bundles_post_ra>
